<compile_context>
chip_gen: v6e
topology: v6e:2x2x1
jax: 0.10.0
libtpu: 0.0.40
codegen_flags: <defaults>
</compile_context>

<pallas_src>
import math
from functools import partial

import jax
import jax.numpy as jnp
from jax.experimental import pallas as pl
from jax.experimental.pallas import tpu as pltpu

_VMEM_LIMIT_BYTES = 32 * 1024 * 1024          # > default scoped VMEM on v5e, safe on v7x
_MASK_VALUE = -0.7 * float(jnp.finfo(jnp.float32).max)


def _pick_tile(dim, preferred, granule):
    """Largest multiple of `granule` that divides `dim` and is <= preferred.

    Falls back to the full dimension (always a legal block) when `dim` is not a
    multiple of `granule` (e.g. the tiny demo shapes).
    """
    if dim % granule != 0:
        return dim
    t = min(preferred, dim)
    t -= t % granule
    while t > 0 and dim % t != 0:
        t -= granule
    return t if t > 0 else dim


# ---------------------------------------------------------------------------
# Tiled linear kernel: o = x @ W + b
# ---------------------------------------------------------------------------
def _linear_kernel(x_ref, w_ref, b_ref, o_ref, acc_ref):
    k = pl.program_id(2)

    @pl.when(k == 0)
    def _init():
        acc_ref[...] = jnp.zeros(acc_ref.shape, acc_ref.dtype)

    acc_ref[...] += jnp.dot(
        x_ref[...], w_ref[...], preferred_element_type=jnp.float32
    )

    @pl.when(k == pl.num_programs(2) - 1)
    def _finalize():
        o_ref[...] = (acc_ref[...] + b_ref[...].astype(jnp.float32)).astype(o_ref.dtype)


def pallas_linear(x2d, w, b, *, out_dtype=None,
                  block_m=256, block_n=256, block_k=512):
    """x2d: (M, K), w: (K, N), b: (N,)  ->  (M, N). Accumulates in f32."""
    M, K = x2d.shape
    N = w.shape[1]
    out_dtype = out_dtype or x2d.dtype

    tm = _pick_tile(M, block_m, 8)
    tn = _pick_tile(N, block_n, 128)
    tk = _pick_tile(K, block_k, 128)

    return pl.pallas_call(
        _linear_kernel,
        out_shape=jax.ShapeDtypeStruct((M, N), out_dtype),
        grid=(M // tm, N // tn, K // tk),
        in_specs=[
            pl.BlockSpec((tm, tk), lambda i, j, k: (i, k)),
            pl.BlockSpec((tk, tn), lambda i, j, k: (k, j)),
            pl.BlockSpec((1, tn), lambda i, j, k: (0, j)),
        ],
        out_specs=pl.BlockSpec((tm, tn), lambda i, j, k: (i, j)),
        scratch_shapes=[pltpu.VMEM((tm, tn), jnp.float32)],
        compiler_params=pltpu.CompilerParams(
            dimension_semantics=("parallel", "parallel", "arbitrary"),
            vmem_limit_bytes=_VMEM_LIMIT_BYTES,
        ),
    )(x2d, w, b.reshape(1, N))


# ---------------------------------------------------------------------------
# Flash-style causal attention kernel
# ---------------------------------------------------------------------------
def _flash_attn_kernel(q_ref, k_ref, v_ref, o_ref, m_scr, l_scr, acc_scr,
                       *, sm_scale, block_q, block_kv):
    qi = pl.program_id(1)
    ki = pl.program_id(2)

    @pl.when(ki == 0)
    def _init():
        m_scr[...] = jnp.full(m_scr.shape, _MASK_VALUE, m_scr.dtype)
        l_scr[...] = jnp.zeros(l_scr.shape, l_scr.dtype)
        acc_scr[...] = jnp.zeros(acc_scr.shape, acc_scr.dtype)

    # Causal block skipping: a KV block whose first column is past this Q block's
    # last row is fully masked -> skip all compute for it.
    # TODO(synk): the skipped KV block is still DMA'd by the BlockSpec pipeline;
    #             avoiding the fetch needs a data-dependent kv extent.
    @pl.when(ki * block_kv <= qi * block_q + (block_q - 1))
    def _compute():
        q = q_ref[...]                                  # (H, tq,  D) bf16
        k = k_ref[...]                                  # (H, tkv, D) bf16
        v = v_ref[...]                                  # (H, tkv, D) bf16

        # Contract on D directly (no k.T relayout); bf16 operands, f32 accumulate.
        s = jnp.einsum("hqd,hkd->hqk", q, k,
                       preferred_element_type=jnp.float32) * sm_scale

        rows = qi * block_q + jax.lax.broadcasted_iota(
            jnp.int32, (block_q, block_kv), 0)
        cols = ki * block_kv + jax.lax.broadcasted_iota(
            jnp.int32, (block_q, block_kv), 1)
        s = jnp.where((rows >= cols)[None, :, :], s, _MASK_VALUE)

        m_prev = m_scr[...]                             # (H, tq, 1)
        m_new = jnp.maximum(m_prev, s.max(axis=-1, keepdims=True))
        alpha = jnp.exp(m_prev - m_new)
        p = jnp.exp(s - m_new)                          # (H, tq, tkv) f32

        l_scr[...] = alpha * l_scr[...] + p.sum(axis=-1, keepdims=True)
        acc_scr[...] = alpha * acc_scr[...] + jnp.einsum(
            "hqk,hkd->hqd", p.astype(v.dtype), v,
            preferred_element_type=jnp.float32)
        m_scr[...] = m_new

    @pl.when(ki == pl.num_programs(2) - 1)
    def _finalize():
        inv_l = pl.reciprocal(l_scr[...], approx=True)
        o_ref[...] = (acc_scr[...] * inv_l).astype(o_ref.dtype)


def flash_causal_attention(q, k, v, *, sm_scale, block_q=128, block_kv=256):
    """q/k/v: (B, H, T, D)  ->  (B, H, T, D). Online softmax, causal."""
    B, H, T, D = q.shape
    tq = _pick_tile(T, block_q, 8)
    tkv = _pick_tile(T, block_kv, 8)

    kernel = partial(_flash_attn_kernel, sm_scale=sm_scale,
                     block_q=tq, block_kv=tkv)

    q_spec = pl.BlockSpec((None, H, tq, D), lambda b, qi, ki: (b, 0, qi, 0))
    kv_spec = pl.BlockSpec((None, H, tkv, D), lambda b, qi, ki: (b, 0, ki, 0))

    return pl.pallas_call(
        kernel,
        out_shape=jax.ShapeDtypeStruct((B, H, T, D), q.dtype),
        grid=(B, T // tq, T // tkv),
        in_specs=[q_spec, kv_spec, kv_spec],
        out_specs=q_spec,
        scratch_shapes=[
            pltpu.VMEM((H, tq, 1), jnp.float32),   # running max m
            pltpu.VMEM((H, tq, 1), jnp.float32),   # running denom l
            pltpu.VMEM((H, tq, D), jnp.float32),   # output accumulator
        ],
        compiler_params=pltpu.CompilerParams(
            dimension_semantics=("parallel", "parallel", "arbitrary"),
            vmem_limit_bytes=_VMEM_LIMIT_BYTES,
        ),
    )(q, k, v)


# ---------------------------------------------------------------------------
# Full forward pass (jitted so the head split/transpose fuses in XLA)
# ---------------------------------------------------------------------------
@partial(jax.jit, static_argnums=(2,))
def causal_self_attention(x, params, n_head):
    """Forward pass matching CasualSelfAttention.forward (bf16 matmuls, f32 acc)."""
    B, T, C = x.shape
    D = C // n_head
    cdt = jnp.bfloat16

    x2d = x.reshape(B * T, C).astype(cdt)
    w_attn = params["w_attn"].astype(cdt)
    w_proj = params["w_proj"].astype(cdt)

    # c_attn: (B*T, C) @ (C, 3C) + (3C,)
    qkv = pallas_linear(x2d, w_attn, params["b_attn"], out_dtype=cdt)
    qkv = qkv.reshape(B, T, 3, n_head, D)
    # TODO(synk): fold this head split/transpose into the QKV projection's
    #             out_specs index_map to remove the XLA transpose passes.
    q = qkv[:, :, 0].transpose(0, 2, 1, 3)            # (B, H, T, D)
    k = qkv[:, :, 1].transpose(0, 2, 1, 3)
    v = qkv[:, :, 2].transpose(0, 2, 1, 3)

    y = flash_causal_attention(q, k, v, sm_scale=1.0 / math.sqrt(D))
    y2d = y.transpose(0, 2, 1, 3).reshape(B * T, C)

    # c_proj: (B*T, C) @ (C, C) + (C,)  -> f32 output (residual path)
    out = pallas_linear(y2d, w_proj, params["b_proj"], out_dtype=jnp.float32)
    return out.reshape(B, T, C)


# ---------------------------------------------------------------------------
# Deterministic parameter init (torch.nn.Linear-style uniform bounds)
# ---------------------------------------------------------------------------
def init_params(key, n_embd):
    k1, k2, k3, k4 = jax.random.split(key, 4)
    bound = 1.0 / math.sqrt(n_embd)
    return {
        "w_attn": jax.random.uniform(
            k1, (n_embd, 3 * n_embd), jnp.float32, -bound, bound
        ),
        "b_attn": jax.random.uniform(k2, (3 * n_embd,), jnp.float32, -bound, bound),
        "w_proj": jax.random.uniform(
            k3, (n_embd, n_embd), jnp.float32, -bound, bound
        ),
        "b_proj": jax.random.uniform(k4, (n_embd,), jnp.float32, -bound, bound),
    }


# ---------------------------------------------------------------------------
# Pure-JAX f32 reference (sanity check)
# ---------------------------------------------------------------------------
def reference(x, params, n_head):
    B, T, C = x.shape
    hd = C // n_head
    qkv = x @ params["w_attn"] + params["b_attn"]
    q, k, v = jnp.split(qkv, 3, axis=2)

    def to_heads(t):
        return t.reshape(B, T, n_head, hd).transpose(0, 2, 1, 3)

    q, k, v = to_heads(q), to_heads(k), to_heads(v)
    s = jnp.einsum("bhqd,bhkd->bhqk", q, k) / math.sqrt(hd)
    mask = jnp.tril(jnp.ones((T, T), dtype=bool))
    s = jnp.where(mask, s, -jnp.inf)
    p = jax.nn.softmax(s, axis=-1)
    y = jnp.einsum("bhqk,bhkd->bhqd", p, v)
    y = y.transpose(0, 2, 1, 3).reshape(B, T, C)
    return y @ params["w_proj"] + params["b_proj"]


if __name__ == "__main__":
    # Small shapes consistent with the module: B=2, T=8, n_embd=32, n_head=4.
    B, T, C, n_head = 2, 8, 32, 4

    key = jax.random.PRNGKey(0)
    kx, kp = jax.random.split(key)
    x = jax.random.normal(kx, (B, T, C), dtype=jnp.float32)
    params = init_params(kp, C)

    y = causal_self_attention(x, params, n_head)
    y = jax.block_until_ready(y)

    y_ref = reference(x, params, n_head)
    assert y.shape == (B, T, C)
    # Looser tolerance than the pure-f32 version: MXU operands are bf16
    # (f32 accumulation), per the performance guidance.
    assert jnp.allclose(y, y_ref, atol=5e-2, rtol=5e-2), "mismatch vs reference"

    print("KERNEL_OK")
</pallas_src>

<mosaic_0001>
module attributes {stable_mosaic.version = 11 : i64} {
  func.func @_linear_kernel(%arg0: i32, %arg1: i32, %arg2: i32, %arg3: memref<16x32xbf16, #tpu.memory_space<vmem>>, %arg4: memref<32x96xbf16, #tpu.memory_space<vmem>>, %arg5: memref<1x96xf32, #tpu.memory_space<vmem>>, %arg6: memref<16x96xbf16, #tpu.memory_space<vmem>>, %arg7: memref<16x96xf32, #tpu.memory_space<vmem>>) attributes {dimension_semantics = [#tpu.dimension_semantics<parallel>, #tpu.dimension_semantics<parallel>, #tpu.dimension_semantics<arbitrary>], iteration_bounds = array<i64: 1, 1, 1>, scalar_prefetch = 0 : i64, scratch_operands = 1 : i64, tpu.core_type = #tpu.core_type<tc>, window_params = [{transform_indices = @transform_0, window_bounds = array<i64: 16, 32>}, {transform_indices = @transform_1, window_bounds = array<i64: 32, 96>}, {transform_indices = @transform_2, window_bounds = array<i64: 1, 96>}, {transform_indices = @transform_3, window_bounds = array<i64: 16, 96>}]} {
    %c0_i32 = arith.constant 0 : i32
    %0 = arith.cmpi eq, %arg2, %c0_i32 : i32
    %1 = arith.extui %0 : i1 to i32
    %c0_i32_0 = arith.constant 0 : i32
    %2 = arith.cmpi ne, %1, %c0_i32_0 : i32
    scf.if %2 {
      %cst_10 = arith.constant 0.000000e+00 : f32
      %12 = vector.broadcast %cst_10 : f32 to vector<16x96xf32>
      %c0_11 = arith.constant 0 : index
      %c0_12 = arith.constant 0 : index
      %13 = vector.load %arg7[%c0_11, %c0_12] : memref<16x96xf32, #tpu.memory_space<vmem>>, vector<16x96xf32>
      tpu.vector_store %arg7[%c0_11, %c0_12], %12 {strides = array<i32>} : memref<16x96xf32, #tpu.memory_space<vmem>>, vector<16x96xf32>,
    } else {
    }
    %c0 = arith.constant 0 : index
    %c0_1 = arith.constant 0 : index
    %3 = vector.load %arg7[%c0, %c0_1] : memref<16x96xf32, #tpu.memory_space<vmem>>, vector<16x96xf32>
    %c0_2 = arith.constant 0 : index
    %c0_3 = arith.constant 0 : index
    %4 = vector.load %arg3[%c0_2, %c0_3] : memref<16x32xbf16, #tpu.memory_space<vmem>>, vector<16x32xbf16>
    %c0_4 = arith.constant 0 : index
    %c0_5 = arith.constant 0 : index
    %5 = vector.load %arg4[%c0_4, %c0_5] : memref<32x96xbf16, #tpu.memory_space<vmem>>, vector<32x96xbf16>
    %cst = arith.constant dense<0.000000e+00> : vector<16x96xf32>
    %6 = tpu.matmul %4, %5, %cst {dimension_numbers = #tpu.dot_dimension_numbers<[1], [0], [0], [1], [0, 0, 1, 1], [], []>} : vector<16x32xbf16>, vector<32x96xbf16>, vector<16x96xf32> -> vector<16x96xf32>
    %7 = arith.addf %3, %6 : vector<16x96xf32>
    %c0_6 = arith.constant 0 : index
    %c0_7 = arith.constant 0 : index
    %8 = vector.load %arg7[%c0_6, %c0_7] : memref<16x96xf32, #tpu.memory_space<vmem>>, vector<16x96xf32>
    tpu.vector_store %arg7[%c0_6, %c0_7], %7 {strides = array<i32>} : memref<16x96xf32, #tpu.memory_space<vmem>>, vector<16x96xf32>,
    %c0_i32_8 = arith.constant 0 : i32
    %9 = arith.cmpi eq, %arg2, %c0_i32_8 : i32
    %10 = arith.extui %9 : i1 to i32
    %c0_i32_9 = arith.constant 0 : i32
    %11 = arith.cmpi ne, %10, %c0_i32_9 : i32
    scf.if %11 {
      %c0_10 = arith.constant 0 : index
      %c0_11 = arith.constant 0 : index
      %12 = vector.load %arg7[%c0_10, %c0_11] : memref<16x96xf32, #tpu.memory_space<vmem>>, vector<16x96xf32>
      %c0_12 = arith.constant 0 : index
      %c0_13 = arith.constant 0 : index
      %13 = vector.load %arg5[%c0_12, %c0_13] : memref<1x96xf32, #tpu.memory_space<vmem>>, vector<1x96xf32>
      %14 = vector.broadcast %13 : vector<1x96xf32> to vector<16x96xf32>
      %15 = arith.addf %12, %14 : vector<16x96xf32>
      %16 = arith.truncf %15 : vector<16x96xf32> to vector<16x96xbf16>
      %c0_14 = arith.constant 0 : index
      %c0_15 = arith.constant 0 : index
      %17 = vector.load %arg6[%c0_14, %c0_15] : memref<16x96xbf16, #tpu.memory_space<vmem>>, vector<16x96xbf16>
      tpu.vector_store %arg6[%c0_14, %c0_15], %16 {strides = array<i32>} : memref<16x96xbf16, #tpu.memory_space<vmem>>, vector<16x96xbf16>,
    } else {
    }
    return
  }
  func.func @transform_0(%arg0: i32, %arg1: i32, %arg2: i32) -> (i32, i32) {
    %c0_i32 = arith.constant 0 : i32
    return %arg0, %arg2 : i32, i32
  }
  func.func @transform_1(%arg0: i32, %arg1: i32, %arg2: i32) -> (i32, i32) {
    %c0_i32 = arith.constant 0 : i32
    return %arg2, %arg1 : i32, i32
  }
  func.func @transform_2(%arg0: i32, %arg1: i32, %arg2: i32) -> (i32, i32) {
    %c0_i32 = arith.constant 0 : i32
    %c0_i32_0 = arith.constant 0 : i32
    return %c0_i32, %arg1 : i32, i32
  }
  func.func @transform_3(%arg0: i32, %arg1: i32, %arg2: i32) -> (i32, i32) {
    %c0_i32 = arith.constant 0 : i32
    return %arg0, %arg1 : i32, i32
  }
}

module attributes {stable_mosaic.version = 11 : i64} {
  func.func @_flash_attn_kernel(%arg0: i32, %arg1: i32, %arg2: i32, %arg3: memref<1x4x8x8xbf16, #tpu.memory_space<vmem>>, %arg4: memref<1x4x8x8xbf16, #tpu.memory_space<vmem>>, %arg5: memref<1x4x8x8xbf16, #tpu.memory_space<vmem>>, %arg6: memref<1x4x8x8xbf16, #tpu.memory_space<vmem>>, %arg7: memref<4x8x1xf32, #tpu.memory_space<vmem>>, %arg8: memref<4x8x1xf32, #tpu.memory_space<vmem>>, %arg9: memref<4x8x8xf32, #tpu.memory_space<vmem>>) attributes {dimension_semantics = [#tpu.dimension_semantics<parallel>, #tpu.dimension_semantics<parallel>, #tpu.dimension_semantics<arbitrary>], iteration_bounds = array<i64: 2, 1, 1>, scalar_prefetch = 0 : i64, scratch_operands = 3 : i64, tpu.core_type = #tpu.core_type<tc>, window_params = [{transform_indices = @transform_0, window_bounds = array<i64: 1, 4, 8, 8>}, {transform_indices = @transform_1, window_bounds = array<i64: 1, 4, 8, 8>}, {transform_indices = @transform_2, window_bounds = array<i64: 1, 4, 8, 8>}, {transform_indices = @transform_3, window_bounds = array<i64: 1, 4, 8, 8>}]} {
    %c0_i32 = arith.constant 0 : i32
    %0 = arith.cmpi eq, %arg2, %c0_i32 : i32
    %1 = arith.extui %0 : i1 to i32
    %c0_i32_0 = arith.constant 0 : i32
    %2 = arith.cmpi ne, %1, %c0_i32_0 : i32
    scf.if %2 {
      %cst = arith.constant -2.38197633E+38 : f32
      %12 = vector.broadcast %cst : f32 to vector<4x8x1xf32>
      %c0 = arith.constant 0 : index
      %c0_5 = arith.constant 0 : index
      %c0_6 = arith.constant 0 : index
      %13 = vector.load %arg7[%c0, %c0_5, %c0_6] : memref<4x8x1xf32, #tpu.memory_space<vmem>>, vector<4x8x1xf32>
      tpu.vector_store %arg7[%c0, %c0_5, %c0_6], %12 {strides = array<i32>} : memref<4x8x1xf32, #tpu.memory_space<vmem>>, vector<4x8x1xf32>,
      %cst_7 = arith.constant 0.000000e+00 : f32
      %14 = vector.broadcast %cst_7 : f32 to vector<4x8x1xf32>
      %c0_8 = arith.constant 0 : index
      %c0_9 = arith.constant 0 : index
      %c0_10 = arith.constant 0 : index
      %15 = vector.load %arg8[%c0_8, %c0_9, %c0_10] : memref<4x8x1xf32, #tpu.memory_space<vmem>>, vector<4x8x1xf32>
      tpu.vector_store %arg8[%c0_8, %c0_9, %c0_10], %14 {strides = array<i32>} : memref<4x8x1xf32, #tpu.memory_space<vmem>>, vector<4x8x1xf32>,
      %cst_11 = arith.constant 0.000000e+00 : f32
      %16 = vector.broadcast %cst_11 : f32 to vector<4x8x8xf32>
      %c0_12 = arith.constant 0 : index
      %c0_13 = arith.constant 0 : index
      %c0_14 = arith.constant 0 : index
      %17 = vector.load %arg9[%c0_12, %c0_13, %c0_14] : memref<4x8x8xf32, #tpu.memory_space<vmem>>, vector<4x8x8xf32>
      tpu.vector_store %arg9[%c0_12, %c0_13, %c0_14], %16 {strides = array<i32>} : memref<4x8x8xf32, #tpu.memory_space<vmem>>, vector<4x8x8xf32>,
    } else {
    }
    %c8_i32 = arith.constant 8 : i32
    %3 = arith.muli %arg2, %c8_i32 : i32
    %c8_i32_1 = arith.constant 8 : i32
    %4 = arith.muli %arg1, %c8_i32_1 : i32
    %c7_i32 = arith.constant 7 : i32
    %5 = arith.addi %4, %c7_i32 : i32
    %6 = arith.cmpi sle, %3, %5 : i32
    %7 = arith.extui %6 : i1 to i32
    %c0_i32_2 = arith.constant 0 : i32
    %8 = arith.cmpi ne, %7, %c0_i32_2 : i32
    scf.if %8 {
      %c0 = arith.constant 0 : index
      %c0_5 = arith.constant 0 : index
      %c0_6 = arith.constant 0 : index
      %c0_7 = arith.constant 0 : index
      %12 = vector.load %arg3[%c0, %c0_5, %c0_6, %c0_7] : memref<1x4x8x8xbf16, #tpu.memory_space<vmem>>, vector<1x4x8x8xbf16>
      %13 = vector.shape_cast %12 : vector<1x4x8x8xbf16> to vector<4x8x8xbf16>
      %c0_8 = arith.constant 0 : index
      %c0_9 = arith.constant 0 : index
      %c0_10 = arith.constant 0 : index
      %c0_11 = arith.constant 0 : index
      %14 = vector.load %arg4[%c0_8, %c0_9, %c0_10, %c0_11] : memref<1x4x8x8xbf16, #tpu.memory_space<vmem>>, vector<1x4x8x8xbf16>
      %15 = vector.shape_cast %14 : vector<1x4x8x8xbf16> to vector<4x8x8xbf16>
      %c0_12 = arith.constant 0 : index
      %c0_13 = arith.constant 0 : index
      %c0_14 = arith.constant 0 : index
      %c0_15 = arith.constant 0 : index
      %16 = vector.load %arg5[%c0_12, %c0_13, %c0_14, %c0_15] : memref<1x4x8x8xbf16, #tpu.memory_space<vmem>>, vector<1x4x8x8xbf16>
      %17 = vector.shape_cast %16 : vector<1x4x8x8xbf16> to vector<4x8x8xbf16>
      "tpu.trace_start"() <{level = 10 : i32, message = "hqd,hkd->hqk"}> : () -> ()
      %cst = arith.constant dense<0.000000e+00> : vector<4x8x8xf32>
      %18 = tpu.matmul %13, %15, %cst {dimension_numbers = #tpu.dot_dimension_numbers<[2], [2], [1], [1], [0, 0, 0, 1, 1, 1], [0], [0]>} : vector<4x8x8xbf16>, vector<4x8x8xbf16>, vector<4x8x8xf32> -> vector<4x8x8xf32>
      "tpu.trace_stop"() : () -> ()
      %cst_16 = arith.constant 0.353553385 : f32
      %19 = vector.broadcast %cst_16 : f32 to vector<4x8x8xf32>
      %20 = arith.mulf %18, %19 : vector<4x8x8xf32>
      %c8_i32_17 = arith.constant 8 : i32
      %21 = arith.muli %arg1, %c8_i32_17 : i32
      %22 = tpu.iota {dimensions = array<i32: 0>} : vector<8x8xi32>
      %23 = vector.broadcast %21 : i32 to vector<8x8xi32>
      %24 = arith.addi %23, %22 : vector<8x8xi32>
      %c8_i32_18 = arith.constant 8 : i32
      %25 = arith.muli %arg2, %c8_i32_18 : i32
      %26 = tpu.iota {dimensions = array<i32: 1>} : vector<8x8xi32>
      %27 = vector.broadcast %25 : i32 to vector<8x8xi32>
      %28 = arith.addi %27, %26 : vector<8x8xi32>
      %29 = arith.cmpi sge, %24, %28 : vector<8x8xi32>
      %30 = vector.shape_cast %29 : vector<8x8xi1> to vector<1x8x8xi1>
      %cst_19 = arith.constant -2.38197633E+38 : f32
      %31 = vector.shape_cast %30 : vector<1x8x8xi1> to vector<1x8x8xi1>
      %32 = vector.broadcast %31 : vector<1x8x8xi1> to vector<4x8x8xi1>
      %33 = vector.broadcast %cst_19 : f32 to vector<4x8x8xf32>
      %34 = arith.select %32, %20, %33 : vector<4x8x8xi1>, vector<4x8x8xf32>
      %c0_20 = arith.constant 0 : index
      %c0_21 = arith.constant 0 : index
      %c0_22 = arith.constant 0 : index
      %35 = vector.load %arg7[%c0_20, %c0_21, %c0_22] : memref<4x8x1xf32, #tpu.memory_space<vmem>>, vector<4x8x1xf32>
      %cst_23 = arith.constant dense<0xFF800000> : vector<4x8xf32>
      %36 = vector.multi_reduction <maximumf>, %34, %cst_23 [2] : vector<4x8x8xf32> to vector<4x8xf32>
      %37 = vector.shape_cast %36 : vector<4x8xf32> to vector<4x8x1xf32>
      %38 = arith.maximumf %35, %37 : vector<4x8x1xf32>
      %39 = arith.subf %35, %38 : vector<4x8x1xf32>
      %40 = math.exp %39 : vector<4x8x1xf32>
      %41 = vector.broadcast %38 : vector<4x8x1xf32> to vector<4x8x8xf32>
      %42 = arith.subf %34, %41 : vector<4x8x8xf32>
      %43 = math.exp %42 : vector<4x8x8xf32>
      %c0_24 = arith.constant 0 : index
      %c0_25 = arith.constant 0 : index
      %c0_26 = arith.constant 0 : index
      %44 = vector.load %arg8[%c0_24, %c0_25, %c0_26] : memref<4x8x1xf32, #tpu.memory_space<vmem>>, vector<4x8x1xf32>
      %45 = arith.mulf %40, %44 : vector<4x8x1xf32>
      %cst_27 = arith.constant dense<0.000000e+00> : vector<4x8xf32>
      %46 = vector.multi_reduction <add>, %43, %cst_27 [2] : vector<4x8x8xf32> to vector<4x8xf32>
      %47 = vector.shape_cast %46 : vector<4x8xf32> to vector<4x8x1xf32>
      %48 = arith.addf %45, %47 : vector<4x8x1xf32>
      %c0_28 = arith.constant 0 : index
      %c0_29 = arith.constant 0 : index
      %c0_30 = arith.constant 0 : index
      %49 = vector.load %arg8[%c0_28, %c0_29, %c0_30] : memref<4x8x1xf32, #tpu.memory_space<vmem>>, vector<4x8x1xf32>
      tpu.vector_store %arg8[%c0_28, %c0_29, %c0_30], %48 {strides = array<i32>} : memref<4x8x1xf32, #tpu.memory_space<vmem>>, vector<4x8x1xf32>,
      %c0_31 = arith.constant 0 : index
      %c0_32 = arith.constant 0 : index
      %c0_33 = arith.constant 0 : index
      %50 = vector.load %arg9[%c0_31, %c0_32, %c0_33] : memref<4x8x8xf32, #tpu.memory_space<vmem>>, vector<4x8x8xf32>
      %51 = vector.broadcast %40 : vector<4x8x1xf32> to vector<4x8x8xf32>
      %52 = arith.mulf %51, %50 : vector<4x8x8xf32>
      %53 = arith.truncf %43 : vector<4x8x8xf32> to vector<4x8x8xbf16>
      "tpu.trace_start"() <{level = 10 : i32, message = "hqk,hkd->hqd"}> : () -> ()
      %cst_34 = arith.constant dense<0.000000e+00> : vector<4x8x8xf32>
      %54 = tpu.matmul %53, %17, %cst_34 {dimension_numbers = #tpu.dot_dimension_numbers<[2], [1], [1], [2], [0, 0, 0, 1, 1, 2], [0], [0]>} : vector<4x8x8xbf16>, vector<4x8x8xbf16>, vector<4x8x8xf32> -> vector<4x8x8xf32>
      "tpu.trace_stop"() : () -> ()
      %55 = arith.addf %52, %54 : vector<4x8x8xf32>
      %c0_35 = arith.constant 0 : index
      %c0_36 = arith.constant 0 : index
      %c0_37 = arith.constant 0 : index
      %56 = vector.load %arg9[%c0_35, %c0_36, %c0_37] : memref<4x8x8xf32, #tpu.memory_space<vmem>>, vector<4x8x8xf32>
      tpu.vector_store %arg9[%c0_35, %c0_36, %c0_37], %55 {strides = array<i32>} : memref<4x8x8xf32, #tpu.memory_space<vmem>>, vector<4x8x8xf32>,
      %c0_38 = arith.constant 0 : index
      %c0_39 = arith.constant 0 : index
      %c0_40 = arith.constant 0 : index
      %57 = vector.load %arg7[%c0_38, %c0_39, %c0_40] : memref<4x8x1xf32, #tpu.memory_space<vmem>>, vector<4x8x1xf32>
      tpu.vector_store %arg7[%c0_38, %c0_39, %c0_40], %38 {strides = array<i32>} : memref<4x8x1xf32, #tpu.memory_space<vmem>>, vector<4x8x1xf32>,
    } else {
    }
    %c0_i32_3 = arith.constant 0 : i32
    %9 = arith.cmpi eq, %arg2, %c0_i32_3 : i32
    %10 = arith.extui %9 : i1 to i32
    %c0_i32_4 = arith.constant 0 : i32
    %11 = arith.cmpi ne, %10, %c0_i32_4 : i32
    scf.if %11 {
      %c0 = arith.constant 0 : index
      %c0_5 = arith.constant 0 : index
      %c0_6 = arith.constant 0 : index
      %12 = vector.load %arg8[%c0, %c0_5, %c0_6] : memref<4x8x1xf32, #tpu.memory_space<vmem>>, vector<4x8x1xf32>
      %13 = tpu.reciprocal %12 {approx = true} : vector<4x8x1xf32> -> vector<4x8x1xf32>
      %c0_7 = arith.constant 0 : index
      %c0_8 = arith.constant 0 : index
      %c0_9 = arith.constant 0 : index
      %14 = vector.load %arg9[%c0_7, %c0_8, %c0_9] : memref<4x8x8xf32, #tpu.memory_space<vmem>>, vector<4x8x8xf32>
      %15 = vector.broadcast %13 : vector<4x8x1xf32> to vector<4x8x8xf32>
      %16 = arith.mulf %14, %15 : vector<4x8x8xf32>
      %17 = arith.truncf %16 : vector<4x8x8xf32> to vector<4x8x8xbf16>
      %c0_10 = arith.constant 0 : index
      %c0_11 = arith.constant 0 : index
      %c0_12 = arith.constant 0 : index
      %c0_13 = arith.constant 0 : index
      %18 = vector.load %arg6[%c0_10, %c0_11, %c0_12, %c0_13] : memref<1x4x8x8xbf16, #tpu.memory_space<vmem>>, vector<1x4x8x8xbf16>
      %19 = vector.shape_cast %18 : vector<1x4x8x8xbf16> to vector<4x8x8xbf16>
      %20 = vector.shape_cast %17 : vector<4x8x8xbf16> to vector<1x4x8x8xbf16>
      tpu.vector_store %arg6[%c0_10, %c0_11, %c0_12, %c0_13], %20 {strides = array<i32>} : memref<1x4x8x8xbf16, #tpu.memory_space<vmem>>, vector<1x4x8x8xbf16>,
    } else {
    }
    return
  }
  func.func @transform_0(%arg0: i32, %arg1: i32, %arg2: i32) -> (i32, i32, i32, i32) {
    %c0_i32 = arith.constant 0 : i32
    %c0_i32_0 = arith.constant 0 : i32
    %c0_i32_1 = arith.constant 0 : i32
    return %arg0, %c0_i32, %arg1, %c0_i32_0 : i32, i32, i32, i32
  }
  func.func @transform_1(%arg0: i32, %arg1: i32, %arg2: i32) -> (i32, i32, i32, i32) {
    %c0_i32 = arith.constant 0 : i32
    %c0_i32_0 = arith.constant 0 : i32
    %c0_i32_1 = arith.constant 0 : i32
    return %arg0, %c0_i32, %arg2, %c0_i32_0 : i32, i32, i32, i32
  }
  func.func @transform_2(%arg0: i32, %arg1: i32, %arg2: i32) -> (i32, i32, i32, i32) {
    %c0_i32 = arith.constant 0 : i32
    %c0_i32_0 = arith.constant 0 : i32
    %c0_i32_1 = arith.constant 0 : i32
    return %arg0, %c0_i32, %arg2, %c0_i32_0 : i32, i32, i32, i32
  }
  func.func @transform_3(%arg0: i32, %arg1: i32, %arg2: i32) -> (i32, i32, i32, i32) {
    %c0_i32 = arith.constant 0 : i32
    %c0_i32_0 = arith.constant 0 : i32
    %c0_i32_1 = arith.constant 0 : i32
    return %arg0, %c0_i32, %arg1, %c0_i32_0 : i32, i32, i32, i32
  }
}

module attributes {stable_mosaic.version = 11 : i64} {
  func.func @_linear_kernel(%arg0: i32, %arg1: i32, %arg2: i32, %arg3: memref<16x32xbf16, #tpu.memory_space<vmem>>, %arg4: memref<32x32xbf16, #tpu.memory_space<vmem>>, %arg5: memref<1x32xf32, #tpu.memory_space<vmem>>, %arg6: memref<16x32xf32, #tpu.memory_space<vmem>>, %arg7: memref<16x32xf32, #tpu.memory_space<vmem>>) attributes {dimension_semantics = [#tpu.dimension_semantics<parallel>, #tpu.dimension_semantics<parallel>, #tpu.dimension_semantics<arbitrary>], iteration_bounds = array<i64: 1, 1, 1>, scalar_prefetch = 0 : i64, scratch_operands = 1 : i64, tpu.core_type = #tpu.core_type<tc>, window_params = [{transform_indices = @transform_0, window_bounds = array<i64: 16, 32>}, {transform_indices = @transform_1, window_bounds = array<i64: 32, 32>}, {transform_indices = @transform_2, window_bounds = array<i64: 1, 32>}, {transform_indices = @transform_3, window_bounds = array<i64: 16, 32>}]} {
    %c0_i32 = arith.constant 0 : i32
    %0 = arith.cmpi eq, %arg2, %c0_i32 : i32
    %1 = arith.extui %0 : i1 to i32
    %c0_i32_0 = arith.constant 0 : i32
    %2 = arith.cmpi ne, %1, %c0_i32_0 : i32
    scf.if %2 {
      %cst_10 = arith.constant 0.000000e+00 : f32
      %12 = vector.broadcast %cst_10 : f32 to vector<16x32xf32>
      %c0_11 = arith.constant 0 : index
      %c0_12 = arith.constant 0 : index
      %13 = vector.load %arg7[%c0_11, %c0_12] : memref<16x32xf32, #tpu.memory_space<vmem>>, vector<16x32xf32>
      tpu.vector_store %arg7[%c0_11, %c0_12], %12 {strides = array<i32>} : memref<16x32xf32, #tpu.memory_space<vmem>>, vector<16x32xf32>,
    } else {
    }
    %c0 = arith.constant 0 : index
    %c0_1 = arith.constant 0 : index
    %3 = vector.load %arg7[%c0, %c0_1] : memref<16x32xf32, #tpu.memory_space<vmem>>, vector<16x32xf32>
    %c0_2 = arith.constant 0 : index
    %c0_3 = arith.constant 0 : index
    %4 = vector.load %arg3[%c0_2, %c0_3] : memref<16x32xbf16, #tpu.memory_space<vmem>>, vector<16x32xbf16>
    %c0_4 = arith.constant 0 : index
    %c0_5 = arith.constant 0 : index
    %5 = vector.load %arg4[%c0_4, %c0_5] : memref<32x32xbf16, #tpu.memory_space<vmem>>, vector<32x32xbf16>
    %cst = arith.constant dense<0.000000e+00> : vector<16x32xf32>
    %6 = tpu.matmul %4, %5, %cst {dimension_numbers = #tpu.dot_dimension_numbers<[1], [0], [0], [1], [0, 0, 1, 1], [], []>} : vector<16x32xbf16>, vector<32x32xbf16>, vector<16x32xf32> -> vector<16x32xf32>
    %7 = arith.addf %3, %6 : vector<16x32xf32>
    %c0_6 = arith.constant 0 : index
    %c0_7 = arith.constant 0 : index
    %8 = vector.load %arg7[%c0_6, %c0_7] : memref<16x32xf32, #tpu.memory_space<vmem>>, vector<16x32xf32>
    tpu.vector_store %arg7[%c0_6, %c0_7], %7 {strides = array<i32>} : memref<16x32xf32, #tpu.memory_space<vmem>>, vector<16x32xf32>,
    %c0_i32_8 = arith.constant 0 : i32
    %9 = arith.cmpi eq, %arg2, %c0_i32_8 : i32
    %10 = arith.extui %9 : i1 to i32
    %c0_i32_9 = arith.constant 0 : i32
    %11 = arith.cmpi ne, %10, %c0_i32_9 : i32
    scf.if %11 {
      %c0_10 = arith.constant 0 : index
      %c0_11 = arith.constant 0 : index
      %12 = vector.load %arg7[%c0_10, %c0_11] : memref<16x32xf32, #tpu.memory_space<vmem>>, vector<16x32xf32>
      %c0_12 = arith.constant 0 : index
      %c0_13 = arith.constant 0 : index
      %13 = vector.load %arg5[%c0_12, %c0_13] : memref<1x32xf32, #tpu.memory_space<vmem>>, vector<1x32xf32>
      %14 = vector.broadcast %13 : vector<1x32xf32> to vector<16x32xf32>
      %15 = arith.addf %12, %14 : vector<16x32xf32>
      %c0_14 = arith.constant 0 : index
      %c0_15 = arith.constant 0 : index
      %16 = vector.load %arg6[%c0_14, %c0_15] : memref<16x32xf32, #tpu.memory_space<vmem>>, vector<16x32xf32>
      tpu.vector_store %arg6[%c0_14, %c0_15], %15 {strides = array<i32>} : memref<16x32xf32, #tpu.memory_space<vmem>>, vector<16x32xf32>,
    } else {
    }
    return
  }
  func.func @transform_0(%arg0: i32, %arg1: i32, %arg2: i32) -> (i32, i32) {
    %c0_i32 = arith.constant 0 : i32
    return %arg0, %arg2 : i32, i32
  }
  func.func @transform_1(%arg0: i32, %arg1: i32, %arg2: i32) -> (i32, i32) {
    %c0_i32 = arith.constant 0 : i32
    return %arg2, %arg1 : i32, i32
  }
  func.func @transform_2(%arg0: i32, %arg1: i32, %arg2: i32) -> (i32, i32) {
    %c0_i32 = arith.constant 0 : i32
    %c0_i32_0 = arith.constant 0 : i32
    return %c0_i32, %arg1 : i32, i32
  }
  func.func @transform_3(%arg0: i32, %arg1: i32, %arg2: i32) -> (i32, i32) {
    %c0_i32 = arith.constant 0 : i32
    return %arg0, %arg1 : i32, i32
  }
}

</mosaic_0001>

<bundles_post_ra>
// kernel: causal_self_attention.3
= control target key start
LH: loop header
LB: loop body
LE: loop exit
PB: predicated region body
PF: predicated region fallthrough
CT: control target
= control target key end

     0   :  { %vm19_vm0 = vcmask 785408   ;;  %v151_v0 = vmov 0.0   ;;  %vm152_vm1 = vmmov 0   ;;  %vm47_vm2 = vcmask 261120   ;;  %s195_s1 = inlined_call_operand.vmem [shape: bf16[32,96], index: 1, kind: input, shape index: {}]   ;;  %s196_s0 = inlined_call_operand.vmem [shape: bf16[16,32], index: 0, kind: input, shape index: {}]   ;;  %s197_s2 = inlined_call_operand.vmem [shape: f32[1,96], index: 2, kind: input, shape index: {}]   ;;  %s198_s3 = inlined_call_operand.vmem [shape: bf16[16,96], index: 3, kind: output, shape index: {}]  }
   0x1   :  { %138 = vmatprep.subr.bf16.mxu0 %v151_v0  ;;  %v148_v1 = vld [vmem:[%s195_s1 + $0x8] sm:$0xff]   ;;  %142 = vmatprep.mubr.msk.bf16.mxu0 %vm152_vm1, %v151_v0  ;;  %20 = vst.msk [vmem:[#allocation2] sm:$0xff] %vm19_vm0, %v151_v0  ;;  %21 = vst.msk [vmem:[#allocation2 + $0x8] sm:$0xff] %vm19_vm0, %v151_v0  ;;  %v149_v2 = vld [vmem:[%s195_s1] sm:$0xff]   ;;  %vm119_vm3 = vcmask 781312  }
   0x2   :  { %139 = vmatpush3.bf16.msra.mxu0 %v148_v1  ;;  %v150_v3 = vld [vmem:[%s196_s0] sm:$0xff]  }
   0x3   :  { %140 = vmatprep.subr.bf16.mxu0 %v151_v0  ;;  %v130_v12 = vld [vmem:[%s197_s2] ss:$0 sm:$0xff] }
   0x6   :  { %141 = vmatpush3.bf16.msra.mxu0 %v149_v2 }
   0x8   :  { %v22_v4 = vld [vmem:[#allocation2] sm:$0xff]  ;;  %v23_v8 = vld [vmem:[#allocation2 + $0x8] sm:$0xff] }
   0x9   :  { %143 = vmatmul.mubr.msk.bf16.vlgmr.msra.gmra.mxu0 %vm47_vm2, %v150_v3 }
  0xc9   :  { %v85_v5 = vpop.f32.mrf.mxu0 }
  0xca   :  { %v92_v6 = vadd.f32 %v85_v5, %v22_v4 }
  0xcb   :  { %v144_v7 = vpop.f32.mrf.mxu0 }
  0xcc   :  { %95 = vst.msk [vmem:[#allocation2] sm:$0xff] %vm19_vm0, %v92_v6 }
  0xcd   :  { %v88_v9 = vpop.f32.mrf.mxu0 }
  0xce   :  { %v93_v10 = vadd.f32 %v88_v9, %v23_v8 }
  0xcf   :  { %v145_v11 = vpop.f32.mrf.mxu0 }
  0xd0   :  { %96 = vst.msk [vmem:[#allocation2 + $0x8] sm:$0xff] %vm19_vm0, %v93_v10 }
  0xd3   :  { %v100_v13 = vld [vmem:[#allocation2] sm:$0xff] }
  0xd4   :  { %v109_v14 = vadd.f32 %v130_v12, %v100_v13 }
  0xd6   :  { %v133_v15 = vpack.c.bf16 %v109_v14, %v109_v14 }
  0xd7   :  { %v101_v16 = vld [vmem:[#allocation2 + $0x8] sm:$0xff] }
  0xd8   :  { %120 = vst.msk [vmem:[%s198_s3] sm:$0xf] %vm119_vm3, %v133_v15  ;;  %v110_v17 = vadd.f32 %v130_v12, %v101_v16 }
  0xda   :  { %v134_v18 = vpack.c.bf16 %v110_v17, %v110_v17 }
  0xdc   :  { %121 = vst.msk [vmem:[%s198_s3 + $0x4] sm:$0xf] %vm119_vm3, %v134_v18 }

// kernel: causal_self_attention.4
= control target key start
LH: loop header
LB: loop body
LE: loop exit
PB: predicated region body
PF: predicated region fallthrough
CT: control target
= control target key end

     0   :  { %s1198_s12 = smov 0   ;;  %s1200_s13 = smov 0   ;;  %s1381_s0 = inlined_call_operand.vmem [shape: bf16[2,4,8,8], index: 0, kind: input, shape index: {}]   ;;  %s1382_s1 = inlined_call_operand.vmem [shape: bf16[2,4,8,8], index: 1, kind: input, shape index: {}]   ;;  %s1383_s2 = inlined_call_operand.vmem [shape: bf16[2,4,8,8], index: 2, kind: input, shape index: {}]   ;;  %s1384_s3 = inlined_call_operand.vmem [shape: bf16[2,4,8,8], index: 3, kind: output, shape index: {}]  }
   0x1   :  { %s1202_s14 = smov 0  }
   0x2 LB: > { %s32_s15 = sadd.s32 1, %s1168_s13  ;;  %p1009_p0 = scmp.ge.s32.totalorder %s1172_s14, 1  ;;  %s1172_s14 = sphi %s1202_s14, %s13_s14   ;;  %s1168_s13 = sphi %s1200_s13, %s1386_s13   ;;  %s1164_s12 = sphi %s1198_s12, %s1385_s12  }
   0x3   : > { %p34_p1 = scmp.ge.s32.totalorder %s32_s15, 2  ;;  %p193_p2 = scmp.lt.s32.totalorder %s1172_s14, 3 }
   0x5   : > { %s1388_s15 = smov (%p34_p1, %s32_s15), 0  ;;  %p194_p3 = pnand %p1009_p0, %p193_p2 }
   0x6   : > { %p239_p4 = scmp.lt.s32.totalorder (!%p194_p3), %s1164_s12, 1 }
   0x7   : > { %197 = sbr.rel (%p194_p3) target bundleno = 807 (0x327), region = 32 }
   0xc   : > { %vm285_vm0 = vcmask 64512   ;;  %v1174_v0 = vmov 0.0   ;;  %s1390_s12 = smov (!%p239_p4, %s1164_s12), 1  ;;  %vm1175_vm1 = vmmov 0   ;;  %vm276_vm2 = vcmask 7168  }
   0xd   : > { %1048 = vmatprep.subr.bf16.mxu0 %v1174_v0  ;;  %1054 = vmatprep.subr.bf16.mxu1 %v1174_v0  ;;  %286 = vst.msk [vmem:[#allocation4] sm:$0xff] %vm285_vm0, %v1174_v0  ;;  %287 = vst.msk [vmem:[#allocation4 + $0x8] sm:$0xff] %vm285_vm0, %v1174_v0  ;;  %s1230_s16 = sshll.u32 %s1390_s12, 4  ;;  %v1176_v13 = vmov -2.3819763e+38   ;;  %v498_v14 = vlaneseq  ;;  %v1177_v45 = vmov 0  }
   0xe   : > { %288 = vst.msk [vmem:[#allocation4 + $0x10] sm:$0xff] %vm285_vm0, %v1174_v0  ;;  %289 = vst.msk [vmem:[#allocation4 + $0x18] sm:$0xff] %vm285_vm0, %v1174_v0  ;;  %1050 = vmatprep.mubr.msk.bf16.mxu0 %vm1175_vm1, %v1174_v0  ;;  %1056 = vmatprep.mubr.msk.bf16.mxu1 %vm1175_vm1, %v1174_v0  ;;  %s254_s19 = scalar_lea.vmem %s1382_s1, %s1230_s16  ;;  %s246_s22 = scalar_lea.vmem %s1381_s0, %s1230_s16  ;;  %vm641_vm4 = vcmask 1043456   ;;  %vm878_vm5 = vcmask 60416  }
   0xf   : > { %v301_v1 = vld [vmem:[%s254_s19] sm:$0xf]  ;;  %v302_v2 = vld [vmem:[%s254_s19 + $0x4] sm:$0xf]  ;;  %v303_v5 = vld [vmem:[%s254_s19 + $0x8] sm:$0xf]  ;;  %1124 = vset.pattern.permute.xlu0 %v1177_v45  ;;  %1125 = vset.pattern.permute.xlu1 %v1177_v45  ;;  %s262_s25 = scalar_lea.vmem %s1383_s2, %s1230_s16  ;;  %s270_s28 = scalar_lea.vmem %s1384_s3, %s1230_s16 }
  0x10   : > { %v314_v3 = vsel %vm285_vm0, %v301_v1, 0  ;;  %v360_v4 = vsel %vm285_vm0, %v302_v2, 0  ;;  %v304_v6 = vld [vmem:[%s254_s19 + $0xc] sm:$0xf]  ;;  %v297_v7 = vld [vmem:[%s246_s22] sm:$0xf] }
  0x11   : > { %1049 = vmatpush3.bf16.xpose.msra.mxu0 %v314_v3  ;;  %1055 = vmatpush3.bf16.xpose.msra.mxu1 %v360_v4  ;;  %v298_v8 = vld [vmem:[%s246_s22 + $0x4] sm:$0xf]  ;;  %v406_v9 = vsel %vm285_vm0, %v303_v5, 0  ;;  %v452_v10 = vsel %vm285_vm0, %v304_v6, 0  ;;  %v299_v11 = vld [vmem:[%s246_s22 + $0x8] sm:$0xf] }
  0x12   : > { %1060 = vmatprep.subr.bf16.mxu0 %v1174_v0  ;;  %1066 = vmatprep.subr.bf16.mxu1 %v1174_v0  ;;  %v300_v12 = vld [vmem:[%s246_s22 + $0xc] sm:$0xf]  ;;  %277 = vst.msk [vmem:[#allocation2] sm:$0xff] %vm276_vm2, %v1176_v13  ;;  %278 = vst.msk [vmem:[#allocation2 + $0x8] sm:$0xff] %vm276_vm2, %v1176_v13  ;;  %v499_v15 = vshrl.u32 %v498_v14, 7  ;;  %v503_v16 = vand.u32 127, %v498_v14 }
  0x13   : > { %279 = vst.msk [vmem:[#allocation2 + $0x10] sm:$0xff] %vm276_vm2, %v1176_v13  ;;  %280 = vst.msk [vmem:[#allocation2 + $0x18] sm:$0xff] %vm276_vm2, %v1176_v13  ;;  %v305_v61 = vld [vmem:[%s262_s25] sm:$0xf]  ;;  %v306_v1 = vld [vmem:[%s262_s25 + $0x4] sm:$0xf] }
  0x14   : > { %281 = vst.msk [vmem:[#allocation3] sm:$0xff] %vm276_vm2, %v1174_v0  ;;  %282 = vst.msk [vmem:[#allocation3 + $0x8] sm:$0xff] %vm276_vm2, %v1174_v0  ;;  %vm506_vm3 = vcmp.ge.s32.totalorder %v499_v15, %v503_v16  ;;  %v643_v63 = vsel %vm641_vm4, %v305_v61, 0  ;;  %v689_v2 = vsel %vm641_vm4, %v306_v1, 0  ;;  %v307_v3 = vld [vmem:[%s262_s25 + $0x8] sm:$0xf] }
  0x15   : > { %283 = vst.msk [vmem:[#allocation3 + $0x10] sm:$0xff] %vm276_vm2, %v1174_v0  ;;  %284 = vst.msk [vmem:[#allocation3 + $0x18] sm:$0xff] %vm276_vm2, %v1174_v0  ;;  %v735_v4 = vsel %vm641_vm4, %v307_v3, 0  ;;  %v308_v5 = vld [vmem:[%s262_s25 + $0xc] sm:$0xf] }
  0x16   : > { %v781_v6 = vsel %vm641_vm4, %v308_v5, 0 }
  0x18   : > { %1051 = vmatmul.mubr.msk.bf16.vlgmr.msra.gmra.mxu0 %vm285_vm0, %v297_v7  ;;  %1057 = vmatmul.mubr.msk.bf16.vlgmr.msra.gmra.mxu1 %vm285_vm0, %v298_v8 }
  0x19   : > { %1061 = vmatpush3.bf16.xpose.msra.mxu0 %v406_v9  ;;  %1067 = vmatpush3.bf16.xpose.msra.mxu1 %v452_v10  ;;  %v1289_v46 = vld [vmem:[#allocation2] sm:$0xff]  ;;  %v1294_v49 = vld [vmem:[#allocation2 + $0x8] sm:$0xff] }
  0x1a   : > { %1062 = vmatprep.mubr.msk.bf16.mxu0 %vm1175_vm1, %v1174_v0  ;;  %1068 = vmatprep.mubr.msk.bf16.mxu1 %vm1175_vm1, %v1174_v0  ;;  %v1304_v53 = vld [vmem:[#allocation2 + $0x10] sm:$0xff]  ;;  %v1314_v57 = vld [vmem:[#allocation2 + $0x18] sm:$0xff] }
  0x1b   : > { %1072 = vmatprep.subr.bf16.mxu0 %v1174_v0  ;;  %1078 = vmatprep.subr.bf16.mxu1 %v1174_v0 }
  0x1c   : > { %v579_v45 = vld [vmem:[#allocation3 + $0x10] sm:$0xff] }
  0x20   : > { %1063 = vmatmul.mubr.msk.bf16.vlgmr.msra.gmra.mxu0 %vm285_vm0, %v299_v11  ;;  %1069 = vmatmul.mubr.msk.bf16.vlgmr.msra.gmra.mxu1 %vm285_vm0, %v300_v12 }
  0x21   : > { %1074 = vmatprep.mubr.msk.bf16.mxu0 %vm1175_vm1, %v1174_v0  ;;  %1080 = vmatprep.mubr.msk.bf16.mxu1 %vm1175_vm1, %v1174_v0 }
  0x22   : > { %1073 = vmatpush3.bf16.msra.mxu0 %v643_v63  ;;  %1079 = vmatpush3.bf16.msra.mxu1 %v689_v2  ;;  %v606_v63 = vld [vmem:[#allocation4] sm:$0xff]  ;;  %v607_v2 = vld [vmem:[#allocation4 + $0x8] sm:$0xff] }
  0x23   : > { %1084 = vmatprep.subr.bf16.mxu0 %v1174_v0  ;;  %1090 = vmatprep.subr.bf16.mxu1 %v1174_v0 }
  0xd8   : > { %v350_v17 = vpop.f32.mrf.mxu0  ;;  %v396_v18 = vpop.f32.mrf.mxu1 }
  0xd9   : > { %v494_v19 = vmul.f32 0.35355338, %v350_v17  ;;  %v495_v20 = vmul.f32 0.35355338, %v396_v18 }
  0xda   : > { %v1052_v21 = vpop.f32.mrf.mxu0  ;;  %v1058_v22 = vpop.f32.mrf.mxu1 }
  0xdb   : > { %v1273_v23 = vsel %vm506_vm3, %v494_v19, -2.3819763e+38  ;;  %v1276_v24 = vsel %vm506_vm3, %v495_v20, -2.3819763e+38 }
  0xdc   : > { %v353_v25 = vpop.f32.mrf.mxu0  ;;  %v399_v26 = vpop.f32.mrf.mxu1  ;;  %v517_v27 = vsel %vm285_vm0, %v1273_v23, -inf  ;;  %v520_v30 = vsel %vm285_vm0, %v1276_v24, -inf }
  0xdd   : > { %518 = vmax.xlane.f32.xlu0 %v517_v27 }
  0xde   : > { %v1053_v28 = vpop.f32.mrf.mxu0  ;;  %v1059_v29 = vpop.f32.mrf.mxu1 }
  0xe0   : > { %v442_v31 = vpop.f32.mrf.mxu0  ;;  %v488_v32 = vpop.f32.mrf.mxu1 }
  0xe1   : > { %v496_v33 = vmul.f32 0.35355338, %v442_v31  ;;  %v497_v34 = vmul.f32 0.35355338, %v488_v32  ;;  %521 = vmax.xlane.f32.xlu0 %v520_v30 }
  0xe2   : > { %v1064_v35 = vpop.f32.mrf.mxu0  ;;  %v1070_v36 = vpop.f32.mrf.mxu1 }
  0xe3   : > { %v511_v37 = vsel %vm506_vm3, %v496_v33, -2.3819763e+38  ;;  %v1284_v38 = vsel %vm506_vm3, %v497_v34, -2.3819763e+38 }
  0xe4   : > { %v445_v39 = vpop.f32.mrf.mxu0  ;;  %v491_v40 = vpop.f32.mrf.mxu1  ;;  %v523_v41 = vsel %vm285_vm0, %v511_v37, -inf  ;;  %v526_v44 = vsel %vm285_vm0, %v1284_v38, -inf }
  0xe5   : > { %524 = vmax.xlane.f32.xlu1 %v523_v41  ;;  %v578_v41 = vld [vmem:[#allocation3 + $0x8] sm:$0xff] }
  0xe6   : > { %v1065_v42 = vpop.f32.mrf.mxu0  ;;  %v1071_v43 = vpop.f32.mrf.mxu1 }
  0xe9   : > { %527 = vmax.xlane.f32.xlu1 %v526_v44 }
 0x166   : > { %v519_v47 = vpop.xlane.xlu0 %518 }
 0x167   : > { %v1292_v48 = vmax.f32 %v1289_v46, %v519_v47 }
 0x169   : > { %v533_v50 = vsub.f32 %v1289_v46, %v1292_v48  ;;  %831 = vst.msk [vmem:[#allocation2] sm:$0xff] %vm276_vm2, %v1292_v48  ;;  %547 = vperm.xlu0 %1124, %v1292_v48  }
 0x16a   : > { %v522_v51 = vpop.xlane.xlu0 %521 }
 0x16b   : > { %v1302_v52 = vmax.f32 %v1294_v49, %v522_v51  ;;  %v537_v30 = vmul.f32 1.442695, %v533_v50 }
 0x16d   : > { %v534_v54 = vsub.f32 %v1294_v49, %v1302_v52  ;;  %832 = vst.msk [vmem:[#allocation2 + $0x8] sm:$0xff] %vm276_vm2, %v1302_v52  ;;  %552 = vperm.xlu1 %1125, %v1302_v52   ;;  %v580_v49 = vld [vmem:[#allocation3 + $0x18] sm:$0xff] }
 0x16e   : > { %v525_v55 = vpop.xlane.xlu1 %524 }
 0x16f   : > { %v1312_v56 = vmax.f32 %v1304_v53, %v525_v55  ;;  %v539_v28 = vmul.f32 1.442695, %v534_v54 }
 0x171   : > { %v535_v58 = vsub.f32 %v1304_v53, %v1312_v56  ;;  %833 = vst.msk [vmem:[#allocation2 + $0x10] sm:$0xff] %vm276_vm2, %v1312_v56  ;;  %557 = vperm.xlu1 %1125, %v1312_v56  }
 0x172   : > { %v528_v59 = vpop.xlane.xlu1 %527 }
 0x173   : > { %v1322_v60 = vmax.f32 %v1314_v57, %v528_v59 }
 0x175   : > { %v536_v62 = vsub.f32 %v1314_v57, %v1322_v60  ;;  %834 = vst.msk [vmem:[#allocation2 + $0x18] sm:$0xff] %vm276_vm2, %v1322_v60  ;;  %562 = vperm.xlu1 %1125, %v1322_v60  }
 0x177   : > { %v543_v33 = vmul.f32 1.442695, %v536_v62 }
 0x1e4   : > { %v548_v7 = vpop.permute.xlu0 %547 }
 0x1e5   : > { %v565_v8 = vsub.f32 %v1273_v23, %v548_v7 }
 0x1e7   : > { %v569_v9 = vmul.f32 1.442695, %v565_v8 }
 0x1e8   : > { %v553_v10 = vpop.permute.xlu1 %552 }
 0x1e9   : > { %1126 = vpow2.f32 %v569_v9  ;;  %v566_v11 = vsub.f32 %v1276_v24, %v553_v10  ;;  %v608_v9 = vld [vmem:[#allocation4 + $0x10] sm:$0xff] }
 0x1eb   : > { %v571_v12 = vmul.f32 1.442695, %v566_v11 }
 0x1ec   : > { %v558_v13 = vpop.permute.xlu1 %557 }
 0x1ed   : > { %1128 = vpow2.f32 %v571_v12  ;;  %v567_v14 = vsub.f32 %v511_v37, %v558_v13 }
 0x1ef   : > { %v573_v15 = vmul.f32 1.442695, %v567_v14 }
 0x1f0   : > { %v563_v16 = vpop.permute.xlu1 %562 }
 0x1f1   : > { %1130 = vpow2.f32 %v573_v15  ;;  %v568_v17 = vsub.f32 %v1284_v38, %v563_v16  ;;  %v577_v38 = vld [vmem:[#allocation3] sm:$0xff] }
 0x1f3   : > { %v575_v18 = vmul.f32 1.442695, %v568_v17  ;;  %v609_v17 = vld [vmem:[#allocation4 + $0x18] sm:$0xff] }
 0x1f5   : > { %1132 = vpow2.f32 %v575_v18 }
 0x1f6   : > { %v1127_v19 = vpop.eup %1126  ;;  %1134 = vpow2.f32 %v539_v28 }
 0x1f7   : > { %v585_v20 = vsel %vm285_vm0, %v1127_v19, 0.0  ;;  %v634_v21 = vpack.c.bf16 %v1127_v19, %v1127_v19  ;;  %1136 = vpow2.f32 %v537_v30 }
 0x1f8   : > { %586 = vadd.xlane.f32.xlu1 %v585_v20 }
 0x1f9   : > { %1075 = vmatmul.mubr.msk.bf16.vlgmr.msra.gmra.mxu0 %vm285_vm0, %v634_v21 }
 0x1fa   : > { %v1129_v22 = vpop.eup %1128  ;;  %1085 = vmatpush3.bf16.msra.mxu0 %v735_v4  ;;  %1086 = vmatprep.mubr.msk.bf16.mxu0 %vm1175_vm1, %v1174_v0 }
 0x1fb   : > { %v588_v23 = vsel %vm285_vm0, %v1129_v22, 0.0  ;;  %v635_v24 = vpack.c.bf16 %v1129_v22, %v1129_v22 }
 0x1fc   : > { %589 = vadd.xlane.f32.xlu0 %v588_v23 }
 0x1fd   : > { %1081 = vmatmul.mubr.msk.bf16.vlgmr.msra.gmra.mxu1 %vm285_vm0, %v635_v24 }
 0x1fe   : > { %v1131_v25 = vpop.eup %1130  ;;  %1091 = vmatpush3.bf16.msra.mxu1 %v781_v6  ;;  %1092 = vmatprep.mubr.msk.bf16.mxu1 %vm1175_vm1, %v1174_v0  ;;  %v541_v0 = vmul.f32 1.442695, %v535_v58 }
 0x1ff   : > { %v591_v26 = vsel %vm285_vm0, %v1131_v25, 0.0  ;;  %v636_v27 = vpack.c.bf16 %v1131_v25, %v1131_v25 }
 0x200   : > { %592 = vadd.xlane.f32.xlu1 %v591_v26  ;;  %1138 = vpow2.f32 %v541_v0 }
 0x201   : > { %1087 = vmatmul.mubr.msk.bf16.vlgmr.msra.gmra.mxu0 %vm285_vm0, %v636_v27  ;;  %1140 = vpow2.f32 %v543_v33 }
 0x202   : > { %v1133_v29 = vpop.eup %1132 }
 0x203   : > { %v594_v31 = vsel %vm285_vm0, %v1133_v29, 0.0  ;;  %v637_v32 = vpack.c.bf16 %v1133_v29, %v1133_v29  ;;  %v1135_v34 = vpop.eup %1134 }
 0x204   : > { %595 = vadd.xlane.f32.xlu1 %v594_v31  ;;  %v1137_v35 = vpop.eup %1136  ;;  %v582_v43 = vmul.f32 %v1135_v34, %v578_v41 }
 0x205   : > { %1093 = vmatmul.mubr.msk.bf16.vlgmr.msra.gmra.mxu1 %vm285_vm0, %v637_v32  ;;  %v581_v39 = vmul.f32 %v1137_v35, %v577_v38 }
 0x20d   : > { %v1139_v36 = vpop.eup %1138 }
 0x20e   : > { %v1141_v37 = vpop.eup %1140  ;;  %v583_v47 = vmul.f32 %v1139_v36, %v579_v45 }
 0x20f   : > { %v584_v52 = vmul.f32 %v1141_v37, %v580_v49 }
 0x212   : > { %617 = vperm.xlu0 %1124, %v1135_v34  }
 0x215   : > { %612 = vperm.xlu1 %1125, %v1137_v35  }
 0x219   : > { %622 = vperm.xlu1 %1125, %v1139_v36  }
 0x21d   : > { %627 = vperm.xlu1 %1125, %v1141_v37  }
 0x281   : > { %v587_v40 = vpop.xlane.xlu1 %586 }
 0x282   : > { %v597_v42 = vadd.f32 %v587_v40, %v581_v39 }
 0x284   : > { %602 = vst.msk [vmem:[#allocation3] sm:$0xff] %vm276_vm2, %v597_v42 }
 0x285   : > { %v590_v44 = vpop.xlane.xlu0 %589 }
 0x286   : > { %v598_v46 = vadd.f32 %v590_v44, %v582_v43 }
 0x288   : > { %603 = vst.msk [vmem:[#allocation3 + $0x8] sm:$0xff] %vm276_vm2, %v598_v46 }
 0x289   : > { %v593_v48 = vpop.xlane.xlu1 %592 }
 0x28a   : > { %v599_v50 = vadd.f32 %v593_v48, %v583_v47 }
 0x28b   : > { %v838_v51 = vld [vmem:[#allocation3] sm:$0xff] }
 0x28c   : > { %604 = vst.msk [vmem:[#allocation3 + $0x10] sm:$0xff] %vm276_vm2, %v599_v50  ;;  %1142 = vrcp.f32 %v838_v51 }
 0x28d   : > { %v596_v53 = vpop.xlane.xlu1 %595  ;;  %v618_v3 = vpop.permute.xlu0 %617 }
 0x28e   : > { %v600_v54 = vadd.f32 %v596_v53, %v584_v52  ;;  %v631_v8 = vmul.f32 %v618_v3, %v607_v2 }
 0x28f   : > { %v839_v55 = vld [vmem:[#allocation3 + $0x8] sm:$0xff] }
 0x290   : > { %605 = vst.msk [vmem:[#allocation3 + $0x18] sm:$0xff] %vm276_vm2, %v600_v54  ;;  %1144 = vrcp.f32 %v839_v55 }
 0x291   : > { %v613_v62 = vpop.permute.xlu1 %612 }
 0x292   : > { %v630_v1 = vmul.f32 %v613_v62, %v606_v63 }
 0x293   : > { %v840_v56 = vld [vmem:[#allocation3 + $0x10] sm:$0xff] }
 0x294   : > { %1146 = vrcp.f32 %v840_v56 }
 0x295   : > { %v623_v5 = vpop.permute.xlu1 %622 }
 0x296   : > { %v632_v15 = vmul.f32 %v623_v5, %v608_v9 }
 0x297   : > { %v841_v57 = vld [vmem:[#allocation3 + $0x18] sm:$0xff] }
 0x298   : > { %1148 = vrcp.f32 %v841_v57 }
 0x299   : > { %v1143_v58 = vpop.eup %1142  ;;  %v628_v16 = vpop.permute.xlu1 %627 }
 0x29a   : > { %852 = vperm.xlu1 %1125, %v1143_v58   ;;  %v633_v23 = vmul.f32 %v628_v16, %v609_v17 }
 0x29d   : > { %v1145_v59 = vpop.eup %1144 }
 0x29e   : > { %857 = vperm.xlu0 %1124, %v1145_v59  }
 0x2a1   : > { %v1147_v60 = vpop.eup %1146 }
 0x2a2   : > { %862 = vperm.xlu1 %1125, %v1147_v60  }
 0x2a5   : > { %v1149_v61 = vpop.eup %1148 }
 0x2a6   : > { %867 = vperm.xlu0 %1124, %v1149_v61  }
 0x2b9   : > { %v679_v4 = vpop.f32.mrf.mxu0 }
 0x2ba   : > { %v823_v6 = vadd.f32 %v679_v4, %v630_v1 }
 0x2bb   : > { %v1076_v7 = vpop.f32.mrf.mxu0 }
 0x2bc   : > { %827 = vst.msk [vmem:[#allocation4] sm:$0xff] %vm285_vm0, %v823_v6 }
 0x2bd   : > { %v682_v10 = vpop.f32.mrf.mxu0  ;;  %v725_v11 = vpop.f32.mrf.mxu1 }
 0x2be   : > { %v824_v12 = vadd.f32 %v725_v11, %v631_v8 }
 0x2bf   : > { %v1077_v13 = vpop.f32.mrf.mxu0  ;;  %v1082_v14 = vpop.f32.mrf.mxu1 }
 0x2c0   : > { %828 = vst.msk [vmem:[#allocation4 + $0x8] sm:$0xff] %vm285_vm0, %v824_v12 }
 0x2c1   : > { %v728_v18 = vpop.f32.mrf.mxu1  ;;  %v771_v19 = vpop.f32.mrf.mxu0 }
 0x2c2   : > { %v825_v20 = vadd.f32 %v771_v19, %v632_v15 }
 0x2c3   : > { %v1083_v21 = vpop.f32.mrf.mxu1  ;;  %v1088_v22 = vpop.f32.mrf.mxu0  ;;  %v846_v32 = vld [vmem:[#allocation4] sm:$0xff] }
 0x2c4   : > { %829 = vst.msk [vmem:[#allocation4 + $0x10] sm:$0xff] %vm285_vm0, %v825_v20 }
 0x2c5   : > { %v774_v24 = vpop.f32.mrf.mxu0  ;;  %v817_v25 = vpop.f32.mrf.mxu1 }
 0x2c6   : > { %v826_v26 = vadd.f32 %v817_v25, %v633_v23 }
 0x2c7   : > { %v1089_v27 = vpop.f32.mrf.mxu0  ;;  %v1094_v28 = vpop.f32.mrf.mxu1  ;;  %v847_v34 = vld [vmem:[#allocation4 + $0x8] sm:$0xff] }
 0x2c8   : > { %830 = vst.msk [vmem:[#allocation4 + $0x18] sm:$0xff] %vm285_vm0, %v826_v26 }
 0x2c9   : > { %v820_v29 = vpop.f32.mrf.mxu1 }
 0x2cb   : > { %v1095_v30 = vpop.f32.mrf.mxu1  ;;  %v848_v39 = vld [vmem:[#allocation4 + $0x10] sm:$0xff] }
 0x2cf   : > { %v849_v43 = vld [vmem:[#allocation4 + $0x18] sm:$0xff] }
 0x315   : > { %v853_v31 = vpop.permute.xlu1 %852 }
 0x316   : > { %v870_v0 = vmul.f32 %v853_v31, %v846_v32 }
 0x318   : > { %v874_v33 = vpack.c.bf16 %v870_v0, %v870_v0 }
 0x319   : > { %v858_v35 = vpop.permute.xlu0 %857 }
 0x31a   : > { %879 = vst.msk [vmem:[%s270_s28] sm:$0xf] %vm878_vm5, %v874_v33  ;;  %v871_v36 = vmul.f32 %v858_v35, %v847_v34 }
 0x31c   : > { %v875_v37 = vpack.c.bf16 %v871_v36, %v871_v36 }
 0x31d   : > { %v863_v38 = vpop.permute.xlu1 %862 }
 0x31e   : > { %880 = vst.msk [vmem:[%s270_s28 + $0x4] sm:$0xf] %vm878_vm5, %v875_v37  ;;  %v872_v40 = vmul.f32 %v863_v38, %v848_v39 }
 0x320   : > { %v876_v41 = vpack.c.bf16 %v872_v40, %v872_v40 }
 0x321   : > { %v868_v42 = vpop.permute.xlu0 %867 }
 0x322   : > { %881 = vst.msk [vmem:[%s270_s28 + $0x8] sm:$0xf] %vm878_vm5, %v876_v41  ;;  %v873_v44 = vmul.f32 %v868_v42, %v849_v43 }
 0x324   : > { %v877_v45 = vpack.c.bf16 %v873_v44, %v873_v44 }
 0x326   : > { %882 = vst.msk [vmem:[%s270_s28 + $0xc] sm:$0xf] %vm878_vm5, %v877_v45 }
 0x327 PF: > { %s13_s14 = sadd.s32 1, %s1172_s14   ;;  %s1385_s12 = smov %s1168_s13 }
 0x328   : > { %p10_p5 = scmp.ge.s32.totalorder %s13_s14, 4   ;;  %s1386_s13 = smov %s1388_s15 }
 0x32a   :  { %12 = sbr.rel (!%p10_p5) target bundleno = 2 (0x2), region = 80 }

// kernel: causal_self_attention.5
= control target key start
LH: loop header
LB: loop body
LE: loop exit
PB: predicated region body
PF: predicated region fallthrough
CT: control target
= control target key end

     0   :  { %v175_v1 = vmov 0.0   ;;  %vm176_vm0 = vmmov 0   ;;  %vm20_vm1 = vcmask 261120   ;;  %s222_s0 = inlined_call_operand.vmem [shape: bf16[16,32], index: 0, kind: input, shape index: {}]   ;;  %s223_s1 = inlined_call_operand.vmem [shape: bf16[32,32], index: 1, kind: input, shape index: {}]   ;;  %s224_s2 = inlined_call_operand.vmem [shape: f32[1,32], index: 2, kind: input, shape index: {}]   ;;  %s225_s3 = inlined_call_operand.hbm [shape: f32[16,32], index: 3, kind: output, shape index: {}]  }
   0x1   :  { %v150_v0 = vld [vmem:[%s223_s1 + $0x8] sm:$0xff]   ;;  %137 = vmatprep.subr.bf16.mxu0 %v175_v1  ;;  %v151_v2 = vld [vmem:[%s223_s1] sm:$0xff]   ;;  %141 = vmatprep.mubr.msk.bf16.mxu0 %vm176_vm0, %v175_v1  ;;  %21 = vst.msk [vmem:[#allocation2] sm:$0xff] %vm20_vm1, %v175_v1  ;;  %22 = vst.msk [vmem:[#allocation2 + $0x8] sm:$0xff] %vm20_vm1, %v175_v1 }
   0x2   :  { %138 = vmatpush3.bf16.msra.mxu0 %v150_v0 }
   0x3   :  { %139 = vmatprep.subr.bf16.mxu0 %v175_v1 }
   0x4   :  { %8 = vsyncpa [#allocation4], 0  ;;  %v152_v3 = vld [vmem:[%s222_s0] sm:$0xff]   ;;  %s177_s0 = smov [#allocation3]  }
   0x5   :  { %v133_v12 = vld [vmem:[%s224_s2] ss:$0 sm:$0xff]  ;;  %s118_s19 = sshll.u32 %s177_s0, 4  ;;  %s119_s19 = int_to_ptr.vmem [resolvable:$true] %s118_s19 }
   0x6   :  { %140 = vmatpush3.bf16.msra.mxu0 %v151_v2  ;;  %s153_s20 = scalar_lea.vmem %s119_s19, 256  ;;  %p158_p1 = scmp.lt.s32.totalorder %s119_s19, %s119_s19 }
   0x7   :  { %p154_p0 = scmp.ne.s32.totalorder %s119_s19, %s153_s20  ;;  %p159_p2 = scmp.lt.s32.totalorder %s153_s20, %s153_s20 }
   0x8   :  { %v23_v4 = vld [vmem:[#allocation2] sm:$0xff]  ;;  %v24_v8 = vld [vmem:[#allocation2 + $0x8] sm:$0xff] }
   0x9   :  { %142 = vmatmul.mubr.msk.bf16.vlgmr.msra.gmra.mxu0 %vm20_vm1, %v152_v3  ;;  %p160_p3 = por %p159_p2, %p158_p1 }
   0xb   :  { %p161_p4 = pnand %p160_p3, %p154_p0 }
  0xc9   :  { %v86_v5 = vpop.f32.mrf.mxu0 }
  0xca   :  { %v93_v6 = vadd.f32 %v86_v5, %v23_v4 }
  0xcb   :  { %v143_v7 = vpop.f32.mrf.mxu0 }
  0xcc   :  { %95 = vst.msk [vmem:[#allocation2] sm:$0xff] %vm20_vm1, %v93_v6 }
  0xcd   :  { %v89_v9 = vpop.f32.mrf.mxu0 }
  0xce   :  { %v94_v10 = vadd.f32 %v89_v9, %v24_v8 }
  0xcf   :  { %v144_v11 = vpop.f32.mrf.mxu0 }
  0xd0   :  { %96 = vst.msk [vmem:[#allocation2 + $0x8] sm:$0xff] %vm20_vm1, %v94_v10 }
  0xd3   :  { %v100_v13 = vld [vmem:[#allocation2] sm:$0xff] }
  0xd4   :  { %v109_v14 = vadd.f32 %v133_v12, %v100_v13 }
  0xd6   :  { %111 = vst.msk [vmem:[#allocation3] sm:$0xff] %vm20_vm1, %v109_v14 }
  0xd7   :  { %v101_v15 = vld [vmem:[#allocation2 + $0x8] sm:$0xff] }
  0xd8   :  { %v110_v16 = vadd.f32 %v133_v12, %v101_v15 }
  0xda   :  { %112 = vst.msk [vmem:[#allocation3 + $0x8] sm:$0xff] %vm20_vm1, %v110_v16 }
  0xdb   :  { %164 = shalt.err (!%p161_p4)
}
  0xdc   :  { %s178_s21 = smov 128   ;;  %s179_s2 = smov 8  }
  0xdd   :  { %124 = dma.vmem_to_hbm [thread:$0]  %s119_s19, 256, %s225_s3, [#allocation4], %s178_s21, %s178_s21, %s179_s2  }
  0xde   :  { %173 = dma.done.wait [#allocation4], 256  }
  0xdf   :  { %174 = vsyncadd [#allocation4], 4294967040 }
  0xe0   :  { %128 = vsyncpa [#allocation4], 1 }

</bundles_post_ra>
